<compile_context>
chip_gen: v6e
topology: v6e:2x2x1
jax: 0.10.0
libtpu: 0.0.40
codegen_flags: <defaults>
</compile_context>

<pallas_src>
import jax
import jax.numpy as jnp
from jax.experimental import pallas as pl
from jax.experimental.pallas import tpu as pltpu


def _round_up(x, m):
    return ((x + m - 1) // m) * m


def _round_down(x, m):
    return (x // m) * m


def _sublane_multiple(itemsize):
    # f32 -> 8 sublanes/vreg, bf16 -> 16, int8/fp8 -> 32.
    return max(8, 32 // max(1, itemsize))


def _vmem_capacity_bytes():
    """Physical VMEM per TensorCore; conservative fallbacks if query fails."""
    try:
        cap = getattr(pltpu.get_tpu_info(), "vmem_capacity_bytes", None)
        if cap:
            return int(cap)
    except Exception:
        pass
    try:
        kind = jax.devices()[0].device_kind.lower()
        if "v7" in kind:
            return 64 * 1024 * 1024
        return 128 * 1024 * 1024            # v5e / v6e
    except Exception:
        return 64 * 1024 * 1024             # most conservative (v7x)


def _coord_search_kernel(c_ref, u_ref, o_ref):
    # c_ref: (P,)       float32 coordinates in SMEM (scalar reads)
    # u_ref: (TB,P,TD)  VMEM tile of U
    # o_ref: (TB,TD)    VMEM tile of the output (lane-dense stores)
    p_dim = u_ref.shape[1]
    # Tiny-K contraction: unrolled VPU weighted sum over P.
    # NOTE: u_ref[:, p, :] is a sublane-strided load; if a bundle dump ever
    # shows Mosaic materializing a per-p (TB,TD) copy, switch to
    #   jnp.sum(u_ref[...] * c_vec[None, :, None], axis=1)
    # with coordinates in a small VMEM tile (single XLU sublane-reduce).
    acc = c_ref[0] * u_ref[:, 0, :].astype(jnp.float32)
    for p in range(1, p_dim):
        acc = acc + c_ref[p] * u_ref[:, p, :].astype(jnp.float32)
    o_ref[...] = acc.astype(o_ref.dtype)


def coordinate_searcher_forward(U, coordinates):
    """U: (B, P, D); coordinates: (P,) -> (B, D), out[b,d] = sum_p U[b,p,d]*c[p]."""
    B, P, D = U.shape
    itemsize = jnp.dtype(U.dtype).itemsize
    sub = _sublane_multiple(itemsize)

    vmem_cap = _vmem_capacity_bytes()
    # Scoped VMEM limit at 3/4 of physical: ~48 MiB on v7x, ~96 MiB on v5e/v6e.
    vmem_limit = min((vmem_cap * 3) // 4, 100 * 1024 * 1024)
    # One "set" = one U block + its output block; double-buffered sets plus
    # compiler intermediates must fit under vmem_limit -> ~40% per set.
    per_set_budget = (vmem_limit * 2) // 5
    bytes_per_bd = (P + 1) * itemsize          # U column + output element

    # TD first (contiguous HBM blocks / widest lane-dense stores), then TB.
    td_cap = _round_down(per_set_budget // (sub * bytes_per_bd), 128)
    TD = min(_round_up(D, 128), max(128, td_cap))
    tb_cap = _round_down(per_set_budget // (TD * bytes_per_bd), sub)
    TB = min(_round_up(B, sub), max(sub, tb_cap))
    # TODO(synk): for very large PCA_num (a single (sub, P, 128) block already
    # over budget), split P onto a trailing "arbitrary" grid axis with a VMEM
    # f32 accumulator and pl.when init/finalize.

    # v7x has two TensorCores: avoid a 1x1 grid when the blocks can be split
    # without dropping below the (8,128) minimum (no-op for tiny inputs).
    if pl.cdiv(B, TB) * pl.cdiv(D, TD) == 1:
        if TD >= 256:
            TD = _round_up(TD // 2, 128)
        elif TB >= 2 * sub:
            TB = _round_up(TB // 2, sub)

    grid = (pl.cdiv(B, TB), pl.cdiv(D, TD))
    out = pl.pallas_call(
        _coord_search_kernel,
        out_shape=jax.ShapeDtypeStruct((B, D), U.dtype),
        grid=grid,
        in_specs=[
            # coordinates: whole (P,) vector, untiled, in SMEM (scalar reads).
            pl.BlockSpec(memory_space=pltpu.MemorySpace.SMEM),
            # U: streaming (TB, P, TD) tile; boundary blocks are masked by
            # Pallas -- safe because out[b, d] depends only on U[b, :, d].
            pl.BlockSpec((TB, P, TD), lambda i, j: (i, 0, j)),
        ],
        out_specs=pl.BlockSpec((TB, TD), lambda i, j: (i, j)),
        compiler_params=pltpu.CompilerParams(
            dimension_semantics=("parallel", "parallel"),
            vmem_limit_bytes=vmem_limit),
        cost_estimate=pl.CostEstimate(
            flops=2 * B * P * D,
            bytes_accessed=itemsize * (B * P * D + B * D) + 4 * P,
            transcendentals=0),
    )(coordinates.astype(jnp.float32), U)
    return out


def init_coordinates(cur_d_list, pca_num):
    """Reproduce the PyTorch __init__ parameter initialization."""
    d_cur = jnp.concatenate(cur_d_list, axis=0)               # (N, ...)
    d_cur = d_cur.reshape(d_cur.shape[0], -1)                 # (N, F)
    d_norm = jnp.linalg.norm(d_cur, ord=2, axis=1)            # (N,)
    d_norm_mean = jnp.mean(d_norm)
    coords = jnp.zeros((pca_num,), dtype=jnp.float32)
    coords = coords.at[0].set(d_norm_mean)
    return coords


if __name__ == "__main__":
    key = jax.random.PRNGKey(0)
    k1, k2, k3 = jax.random.split(key, 3)

    B = 2          # batch
    PCA_num = 8    # number of PCA components
    D = 32         # flattened parameter dimension

    # Synthetic cur_d list (what __init__ would have received).
    cur_d = [
        jax.random.normal(k1, (3, 4, 8), dtype=jnp.float32),
        jax.random.normal(k2, (2, 4, 8), dtype=jnp.float32),
    ]
    coordinates = init_coordinates(cur_d, PCA_num)

    # Forward input U: (B, P, D).
    U = jax.random.normal(k3, (B, PCA_num, D), dtype=jnp.float32)

    out = coordinate_searcher_forward(U, coordinates)
    out = jax.block_until_ready(out)

    # Reference check in plain JAX (same semantics as torch.matmul(U^T, c)).
    ref = jnp.einsum("bpd,p->bd", U, coordinates)
    assert out.shape == (B, D)
    assert jnp.allclose(out, ref, atol=1e-5, rtol=1e-5)

    print("KERNEL_OK")
</pallas_src>

<mosaic_0001>
module attributes {stable_mosaic.version = 11 : i64} {
  func.func @_coord_search_kernel(%arg0: i32, %arg1: i32, %arg2: memref<8xf32, #tpu.memory_space<smem>>, %arg3: memref<8x8x128xf32, #tpu.memory_space<vmem>>, %arg4: memref<8x128xf32, #tpu.memory_space<vmem>>) attributes {dimension_semantics = [#tpu.dimension_semantics<parallel>, #tpu.dimension_semantics<parallel>], iteration_bounds = array<i64: 1, 1>, scalar_prefetch = 0 : i64, scratch_operands = 0 : i64, tpu.core_type = #tpu.core_type<tc>, window_params = [{transform_indices = @transform_0, window_bounds = array<i64: 8>}, {transform_indices = @transform_1, window_bounds = array<i64: 8, 8, 128>}, {transform_indices = @transform_2, window_bounds = array<i64: 8, 128>}]} {
    %c0 = arith.constant 0 : index
    %0 = memref.load %arg2[%c0] : memref<8xf32, #tpu.memory_space<smem>>
    %c0_0 = arith.constant 0 : index
    %c0_1 = arith.constant 0 : index
    %c0_2 = arith.constant 0 : index
    %1 = vector.load %arg3[%c0_0, %c0_1, %c0_2] : memref<8x8x128xf32, #tpu.memory_space<vmem>>, vector<8x1x128xf32>
    %2 = vector.shape_cast %1 : vector<8x1x128xf32> to vector<8x128xf32>
    %3 = vector.broadcast %0 : f32 to vector<8x128xf32>
    %4 = arith.mulf %3, %2 : vector<8x128xf32>
    %c1 = arith.constant 1 : index
    %5 = memref.load %arg2[%c1] : memref<8xf32, #tpu.memory_space<smem>>
    %c0_3 = arith.constant 0 : index
    %c1_4 = arith.constant 1 : index
    %c0_5 = arith.constant 0 : index
    %6 = vector.load %arg3[%c0_3, %c1_4, %c0_5] : memref<8x8x128xf32, #tpu.memory_space<vmem>>, vector<8x1x128xf32>
    %7 = vector.shape_cast %6 : vector<8x1x128xf32> to vector<8x128xf32>
    %8 = vector.broadcast %5 : f32 to vector<8x128xf32>
    %9 = arith.mulf %8, %7 : vector<8x128xf32>
    %10 = arith.addf %4, %9 : vector<8x128xf32>
    %c2 = arith.constant 2 : index
    %11 = memref.load %arg2[%c2] : memref<8xf32, #tpu.memory_space<smem>>
    %c0_6 = arith.constant 0 : index
    %c2_7 = arith.constant 2 : index
    %c0_8 = arith.constant 0 : index
    %12 = vector.load %arg3[%c0_6, %c2_7, %c0_8] : memref<8x8x128xf32, #tpu.memory_space<vmem>>, vector<8x1x128xf32>
    %13 = vector.shape_cast %12 : vector<8x1x128xf32> to vector<8x128xf32>
    %14 = vector.broadcast %11 : f32 to vector<8x128xf32>
    %15 = arith.mulf %14, %13 : vector<8x128xf32>
    %16 = arith.addf %10, %15 : vector<8x128xf32>
    %c3 = arith.constant 3 : index
    %17 = memref.load %arg2[%c3] : memref<8xf32, #tpu.memory_space<smem>>
    %c0_9 = arith.constant 0 : index
    %c3_10 = arith.constant 3 : index
    %c0_11 = arith.constant 0 : index
    %18 = vector.load %arg3[%c0_9, %c3_10, %c0_11] : memref<8x8x128xf32, #tpu.memory_space<vmem>>, vector<8x1x128xf32>
    %19 = vector.shape_cast %18 : vector<8x1x128xf32> to vector<8x128xf32>
    %20 = vector.broadcast %17 : f32 to vector<8x128xf32>
    %21 = arith.mulf %20, %19 : vector<8x128xf32>
    %22 = arith.addf %16, %21 : vector<8x128xf32>
    %c4 = arith.constant 4 : index
    %23 = memref.load %arg2[%c4] : memref<8xf32, #tpu.memory_space<smem>>
    %c0_12 = arith.constant 0 : index
    %c4_13 = arith.constant 4 : index
    %c0_14 = arith.constant 0 : index
    %24 = vector.load %arg3[%c0_12, %c4_13, %c0_14] : memref<8x8x128xf32, #tpu.memory_space<vmem>>, vector<8x1x128xf32>
    %25 = vector.shape_cast %24 : vector<8x1x128xf32> to vector<8x128xf32>
    %26 = vector.broadcast %23 : f32 to vector<8x128xf32>
    %27 = arith.mulf %26, %25 : vector<8x128xf32>
    %28 = arith.addf %22, %27 : vector<8x128xf32>
    %c5 = arith.constant 5 : index
    %29 = memref.load %arg2[%c5] : memref<8xf32, #tpu.memory_space<smem>>
    %c0_15 = arith.constant 0 : index
    %c5_16 = arith.constant 5 : index
    %c0_17 = arith.constant 0 : index
    %30 = vector.load %arg3[%c0_15, %c5_16, %c0_17] : memref<8x8x128xf32, #tpu.memory_space<vmem>>, vector<8x1x128xf32>
    %31 = vector.shape_cast %30 : vector<8x1x128xf32> to vector<8x128xf32>
    %32 = vector.broadcast %29 : f32 to vector<8x128xf32>
    %33 = arith.mulf %32, %31 : vector<8x128xf32>
    %34 = arith.addf %28, %33 : vector<8x128xf32>
    %c6 = arith.constant 6 : index
    %35 = memref.load %arg2[%c6] : memref<8xf32, #tpu.memory_space<smem>>
    %c0_18 = arith.constant 0 : index
    %c6_19 = arith.constant 6 : index
    %c0_20 = arith.constant 0 : index
    %36 = vector.load %arg3[%c0_18, %c6_19, %c0_20] : memref<8x8x128xf32, #tpu.memory_space<vmem>>, vector<8x1x128xf32>
    %37 = vector.shape_cast %36 : vector<8x1x128xf32> to vector<8x128xf32>
    %38 = vector.broadcast %35 : f32 to vector<8x128xf32>
    %39 = arith.mulf %38, %37 : vector<8x128xf32>
    %40 = arith.addf %34, %39 : vector<8x128xf32>
    %c7 = arith.constant 7 : index
    %41 = memref.load %arg2[%c7] : memref<8xf32, #tpu.memory_space<smem>>
    %c0_21 = arith.constant 0 : index
    %c7_22 = arith.constant 7 : index
    %c0_23 = arith.constant 0 : index
    %42 = vector.load %arg3[%c0_21, %c7_22, %c0_23] : memref<8x8x128xf32, #tpu.memory_space<vmem>>, vector<8x1x128xf32>
    %43 = vector.shape_cast %42 : vector<8x1x128xf32> to vector<8x128xf32>
    %44 = vector.broadcast %41 : f32 to vector<8x128xf32>
    %45 = arith.mulf %44, %43 : vector<8x128xf32>
    %46 = arith.addf %40, %45 : vector<8x128xf32>
    %c0_24 = arith.constant 0 : index
    %c0_25 = arith.constant 0 : index
    %47 = vector.load %arg4[%c0_24, %c0_25] : memref<8x128xf32, #tpu.memory_space<vmem>>, vector<8x128xf32>
    tpu.vector_store %arg4[%c0_24, %c0_25], %46 {strides = array<i32>} : memref<8x128xf32, #tpu.memory_space<vmem>>, vector<8x128xf32>,
    return
  }
  func.func @transform_0(%arg0: i32, %arg1: i32) -> i32 {
    %c0_i32 = arith.constant 0 : i32
    %c0_i32_0 = arith.constant 0 : i32
    return %c0_i32 : i32
  }
  func.func @transform_1(%arg0: i32, %arg1: i32) -> (i32, i32, i32) {
    %c0_i32 = arith.constant 0 : i32
    %c0_i32_0 = arith.constant 0 : i32
    return %arg0, %c0_i32, %arg1 : i32, i32, i32
  }
  func.func @transform_2(%arg0: i32, %arg1: i32) -> (i32, i32) {
    %c0_i32 = arith.constant 0 : i32
    return %arg0, %arg1 : i32, i32
  }
}

</mosaic_0001>

<bundles_post_ra>
// kernel: tpu_custom_call.1
= control target key start
LH: loop header
LB: loop body
LE: loop exit
PB: predicated region body
PF: predicated region fallthrough
CT: control target
= control target key end

     0   :  { %7 = vsyncpa [#allocation5], 0  ;;  %s404_s0 = inlined_call_operand.hbm [shape: f32[8], index: 0, kind: input, shape index: {}]   ;;  %s405_s1 = inlined_call_operand.hbm [shape: f32[2,8,32], index: 1, kind: input, shape index: {}]   ;;  %s406_s2 = inlined_call_operand.hbm [shape: f32[2,32], index: 2, kind: output, shape index: {}]  }
   0x1   :  { %8 = vsyncpa [#allocation3], 0 }
   0x2   :  { %9 = vsyncpa [#allocation4], 0  ;;  %s354_s9 = smov [#allocation2]  }
   0x3   :  { %17 = dma.hbm_to_smem %s404_s0, 16, %s354_s9, [#allocation5]  }
   0x4   :  { %22 = vsyncadd [#allocation3], 768  ;;  %s355_s12 = smov [#allocation6]  }
   0x5   :  { %s23_s13 = sshll.u32 %s355_s12, 4  ;;  %s24_s13 = int_to_ptr.vmem [resolvable:$true] %s23_s13 }
   0x6   :  { %s316_s14 = scalar_lea.vmem %s24_s13, 256  ;;  %s320_s15 = scalar_lea.vmem %s24_s13, 1024 }
   0x7   :  { %p317_p0 = scmp.ne.s32.totalorder %s24_s13, %s316_s14  ;;  %p321_p1 = scmp.lt.s32.totalorder %s24_s13, %s24_s13 }
   0x8   :  { %p322_p2 = scmp.lt.s32.totalorder %s320_s15, %s316_s14 }
   0xa   :  { %p323_p3 = por %p322_p2, %p321_p1 }
   0xc   :  { %p324_p4 = pnand %p323_p3, %p317_p0 }
   0xe   :  { %327 = shalt.err (!%p324_p4)
}
   0xf   :  { %s356_s16 = smov 128   ;;  %s357_s17 = smov 8  }
  0x10   :  { %29 = dma.hbm_to_vmem [thread:$0]  %s405_s1, 256, %s24_s13, [#allocation3], %s356_s16, %s356_s16, %s357_s17  }
  0x11   :  { %348 = dma.done.wait [#allocation5], 16  }
  0x12   :  { %349 = vsyncadd [#allocation5], 4294967280 }
  0x13   :  { %350 = dma.done.wait [#allocation3], 1024  }
  0x14   :  { %351 = vsyncadd [#allocation3], 4294966272 }
  0x15   :  { %36 = sfence }
  0x16   :  { %s37_s0 = sld [smem:[#allocation2]]  ;;  %v38_v0 = vld [vmem:[#allocation6] sm:$0x1]  ;;  %v39_v1 = vld [vmem:[#allocation6 + $0x8] sm:$0x1]  ;;  %vm246_vm0 = vcmask 1041409  }
  0x17   :  { %s286_s20 = sld [smem:[#allocation2 + $0x1]]  ;;  %v40_v2 = vld [vmem:[#allocation6 + $0x10] sm:$0x1]  ;;  %v41_v3 = vld [vmem:[#allocation6 + $0x18] sm:$0x1]  ;;  %vm249_vm1 = vcmask 1042434  }
  0x18   :  { %v42_v4 = vld [vmem:[#allocation6 + $0x20] sm:$0x1]  ;;  %v43_v5 = vld [vmem:[#allocation6 + $0x28] sm:$0x1]  ;;  %v44_v6 = vld [vmem:[#allocation6 + $0x30] sm:$0x1] }
  0x19   :  { %v45_v7 = vld [vmem:[#allocation6 + $0x38] sm:$0x1]  ;;  %v56_v9 = vld [vmem:[#allocation6 + $0x1] sm:$0x1]  ;;  %v57_v10 = vld [vmem:[#allocation6 + $0x9] sm:$0x1] }
  0x1a   :  { %s382_s21 = sld [smem:[#allocation2 + $0x2]]  ;;  %v58_v12 = vld [vmem:[#allocation6 + $0x11] sm:$0x1]  ;;  %v59_v13 = vld [vmem:[#allocation6 + $0x19] sm:$0x1]  ;;  %vm252_vm2 = vcmask 1043459  }
  0x1b   :  { %v60_v14 = vld [vmem:[#allocation6 + $0x21] sm:$0x1]  ;;  %v61_v19 = vld [vmem:[#allocation6 + $0x29] sm:$0x1]  ;;  %v62_v20 = vld [vmem:[#allocation6 + $0x31] sm:$0x1] }
  0x1c   :  { %v46_v8 = vstv %s37_s0  ;;  %v63_v21 = vld [vmem:[#allocation6 + $0x39] sm:$0x1]  ;;  %v82_v30 = vld [vmem:[#allocation6 + $0x2] sm:$0x1]  ;;  %v83_v35 = vld [vmem:[#allocation6 + $0xa] sm:$0x1] }
  0x1d   :  { %v47_v11 = vmul.f32 %v46_v8, %v38_v0  ;;  %v48_v15 = vmul.f32 %v46_v8, %v39_v1  ;;  %v49_v16 = vmul.f32 %v46_v8, %v40_v2  ;;  %v50_v17 = vmul.f32 %v46_v8, %v41_v3  ;;  %v84_v36 = vld [vmem:[#allocation6 + $0x12] sm:$0x1]  ;;  %s384_s1 = sld [smem:[#allocation2 + $0x3]]  ;;  %v85_v38 = vld [vmem:[#allocation6 + $0x1a] sm:$0x1] }
  0x1e   :  { %v51_v18 = vmul.f32 %v46_v8, %v42_v4  ;;  %v52_v22 = vmul.f32 %v46_v8, %v43_v5  ;;  %v53_v23 = vmul.f32 %v46_v8, %v44_v6  ;;  %v54_v24 = vmul.f32 %v46_v8, %v45_v7  ;;  %v86_v39 = vld [vmem:[#allocation6 + $0x22] sm:$0x1]  ;;  %s386_s22 = sld [smem:[#allocation2 + $0x4]]  ;;  %v87_v44 = vld [vmem:[#allocation6 + $0x2a] sm:$0x1] }
  0x1f   :  { %v64_v25 = vstv %s286_s20  ;;  %v88_v45 = vld [vmem:[#allocation6 + $0x32] sm:$0x1]  ;;  %v89_v46 = vld [vmem:[#allocation6 + $0x3a] sm:$0x1]  ;;  %v108_v59 = vld [vmem:[#allocation6 + $0x3] sm:$0x1] }
  0x20   :  { %v65_v26 = vmul.f32 %v64_v25, %v56_v9  ;;  %v66_v27 = vmul.f32 %v64_v25, %v57_v10  ;;  %v67_v28 = vmul.f32 %v64_v25, %v58_v12  ;;  %v68_v29 = vmul.f32 %v64_v25, %v59_v13  ;;  %v109_v60 = vld [vmem:[#allocation6 + $0xb] sm:$0x1]  ;;  %v110_v63 = vld [vmem:[#allocation6 + $0x13] sm:$0x1]  ;;  %v111_v0 = vld [vmem:[#allocation6 + $0x1b] sm:$0x1] }
  0x21   :  { %v69_v31 = vmul.f32 %v64_v25, %v60_v14  ;;  %v70_v32 = vmul.f32 %v64_v25, %v61_v19  ;;  %v71_v33 = vmul.f32 %v64_v25, %v62_v20  ;;  %v72_v34 = vmul.f32 %v64_v25, %v63_v21  ;;  %v112_v1 = vld [vmem:[#allocation6 + $0x23] sm:$0x1]  ;;  %v113_v6 = vld [vmem:[#allocation6 + $0x2b] sm:$0x1]  ;;  %v114_v7 = vld [vmem:[#allocation6 + $0x33] sm:$0x1] }
  0x22   :  { %v73_v37 = vadd.f32 %v65_v26, %v47_v11  ;;  %v74_v40 = vadd.f32 %v66_v27, %v48_v15  ;;  %v75_v41 = vadd.f32 %v67_v28, %v49_v16  ;;  %v76_v42 = vadd.f32 %v68_v29, %v50_v17  ;;  %v115_v8 = vld [vmem:[#allocation6 + $0x3b] sm:$0x1]  ;;  %v134_v12 = vld [vmem:[#allocation6 + $0x4] sm:$0x1]  ;;  %s391_s23 = sld [smem:[#allocation2 + $0x5]] }
  0x23   :  { %v77_v43 = vadd.f32 %v69_v31, %v51_v18  ;;  %v78_v47 = vadd.f32 %v70_v32, %v52_v22  ;;  %v79_v48 = vadd.f32 %v71_v33, %v53_v23  ;;  %v80_v49 = vadd.f32 %v72_v34, %v54_v24  ;;  %v135_v18 = vld [vmem:[#allocation6 + $0xc] sm:$0x1]  ;;  %v136_v19 = vld [vmem:[#allocation6 + $0x14] sm:$0x1]  ;;  %s393_s24 = sld [smem:[#allocation2 + $0x6]] }
  0x24   :  { %v90_v50 = vstv %s382_s21  ;;  %v116_v11 = vstv %s384_s1  ;;  %v142_v13 = vstv %s386_s22  ;;  %v137_v24 = vld [vmem:[#allocation6 + $0x1c] sm:$0x1]  ;;  %v138_v25 = vld [vmem:[#allocation6 + $0x24] sm:$0x1]  ;;  %s395_s25 = sld [smem:[#allocation2 + $0x7]]  ;;  %vm255_vm3 = vcmask 1044484  }
  0x25   :  { %v91_v51 = vmul.f32 %v90_v50, %v82_v30  ;;  %v92_v52 = vmul.f32 %v90_v50, %v83_v35  ;;  %v93_v53 = vmul.f32 %v90_v50, %v84_v36  ;;  %v94_v54 = vmul.f32 %v90_v50, %v85_v38  ;;  %v139_v30 = vld [vmem:[#allocation6 + $0x2c] sm:$0x1]  ;;  %v140_v31 = vld [vmem:[#allocation6 + $0x34] sm:$0x1]  ;;  %v141_v32 = vld [vmem:[#allocation6 + $0x3c] sm:$0x1] }
  0x26   :  { %v95_v55 = vmul.f32 %v90_v50, %v86_v39  ;;  %v96_v56 = vmul.f32 %v90_v50, %v87_v44  ;;  %v97_v57 = vmul.f32 %v90_v50, %v88_v45  ;;  %v98_v58 = vmul.f32 %v90_v50, %v89_v46  ;;  %v160_v45 = vld [vmem:[#allocation6 + $0x5] sm:$0x1]  ;;  %v161_v46 = vld [vmem:[#allocation6 + $0xd] sm:$0x1]  ;;  %v162_v50 = vld [vmem:[#allocation6 + $0x15] sm:$0x1] }
  0x27   :  { %v99_v61 = vadd.f32 %v91_v51, %v73_v37  ;;  %v100_v62 = vadd.f32 %v92_v52, %v74_v40  ;;  %v101_v2 = vadd.f32 %v93_v53, %v75_v41  ;;  %v102_v3 = vadd.f32 %v94_v54, %v76_v42  ;;  %v163_v51 = vld [vmem:[#allocation6 + $0x1d] sm:$0x1]  ;;  %v164_v52 = vld [vmem:[#allocation6 + $0x25] sm:$0x1] }
  0x28   :  { %v103_v4 = vadd.f32 %v95_v55, %v77_v43  ;;  %v104_v5 = vadd.f32 %v96_v56, %v78_v47  ;;  %v105_v9 = vadd.f32 %v97_v57, %v79_v48  ;;  %v106_v10 = vadd.f32 %v98_v58, %v80_v49  ;;  %v165_v57 = vld [vmem:[#allocation6 + $0x2d] sm:$0x1]  ;;  %v166_v58 = vld [vmem:[#allocation6 + $0x35] sm:$0x1] }
  0x29   :  { %v117_v14 = vmul.f32 %v116_v11, %v108_v59  ;;  %v118_v15 = vmul.f32 %v116_v11, %v109_v60  ;;  %v119_v16 = vmul.f32 %v116_v11, %v110_v63  ;;  %v120_v17 = vmul.f32 %v116_v11, %v111_v0  ;;  %v167_v59 = vld [vmem:[#allocation6 + $0x3d] sm:$0x1] }
  0x2a   :  { %v121_v20 = vmul.f32 %v116_v11, %v112_v1  ;;  %v122_v21 = vmul.f32 %v116_v11, %v113_v6  ;;  %v123_v22 = vmul.f32 %v116_v11, %v114_v7  ;;  %v124_v23 = vmul.f32 %v116_v11, %v115_v8  ;;  %v189_v11 = vld [vmem:[#allocation6 + $0x1e] sm:$0x1] }
  0x2b   :  { %v125_v26 = vadd.f32 %v117_v14, %v99_v61  ;;  %v126_v27 = vadd.f32 %v118_v15, %v100_v62  ;;  %v127_v28 = vadd.f32 %v119_v16, %v101_v2  ;;  %v128_v29 = vadd.f32 %v120_v17, %v102_v3  ;;  %v191_v17 = vld [vmem:[#allocation6 + $0x2e] sm:$0x1] }
  0x2c   :  { %v129_v33 = vadd.f32 %v121_v20, %v103_v4  ;;  %v130_v34 = vadd.f32 %v122_v21, %v104_v5  ;;  %v131_v35 = vadd.f32 %v123_v22, %v105_v9  ;;  %v132_v36 = vadd.f32 %v124_v23, %v106_v10  ;;  %v186_v4 = vld [vmem:[#allocation6 + $0x6] sm:$0x1]  ;;  %v187_v5 = vld [vmem:[#allocation6 + $0xe] sm:$0x1]  ;;  %v188_v10 = vld [vmem:[#allocation6 + $0x16] sm:$0x1] }
  0x2d   :  { %v143_v37 = vmul.f32 %v142_v13, %v134_v12  ;;  %v144_v38 = vmul.f32 %v142_v13, %v135_v18  ;;  %v145_v39 = vmul.f32 %v142_v13, %v136_v19  ;;  %v146_v40 = vmul.f32 %v142_v13, %v137_v24  ;;  %v190_v12 = vld [vmem:[#allocation6 + $0x26] sm:$0x1]  ;;  %v192_v18 = vld [vmem:[#allocation6 + $0x36] sm:$0x1]  ;;  %v193_v19 = vld [vmem:[#allocation6 + $0x3e] sm:$0x1] }
  0x2e   :  { %v147_v41 = vmul.f32 %v142_v13, %v138_v25  ;;  %v148_v42 = vmul.f32 %v142_v13, %v139_v30  ;;  %v149_v43 = vmul.f32 %v142_v13, %v140_v31  ;;  %v150_v44 = vmul.f32 %v142_v13, %v141_v32 }
  0x2f   :  { %v151_v47 = vadd.f32 %v143_v37, %v125_v26  ;;  %v152_v48 = vadd.f32 %v144_v38, %v126_v27  ;;  %v153_v49 = vadd.f32 %v145_v39, %v127_v28  ;;  %v154_v53 = vadd.f32 %v146_v40, %v128_v29  ;;  %v212_v28 = vld [vmem:[#allocation6 + $0x7] sm:$0x1]  ;;  %v213_v29 = vld [vmem:[#allocation6 + $0xf] sm:$0x1] }
  0x30   :  { %v155_v54 = vadd.f32 %v147_v41, %v129_v33  ;;  %v156_v55 = vadd.f32 %v148_v42, %v130_v34  ;;  %v157_v56 = vadd.f32 %v149_v43, %v131_v35  ;;  %v158_v60 = vadd.f32 %v150_v44, %v132_v36  ;;  %v214_v34 = vld [vmem:[#allocation6 + $0x17] sm:$0x1]  ;;  %v215_v35 = vld [vmem:[#allocation6 + $0x1f] sm:$0x1]  ;;  %v216_v36 = vld [vmem:[#allocation6 + $0x27] sm:$0x1] }
  0x31   :  { %v168_v61 = vstv %s391_s23  ;;  %v194_v62 = vstv %s393_s24  ;;  %v220_v63 = vstv %s395_s25  ;;  %v217_v41 = vld [vmem:[#allocation6 + $0x2f] sm:$0x1]  ;;  %v218_v42 = vld [vmem:[#allocation6 + $0x37] sm:$0x1]  ;;  %v219_v43 = vld [vmem:[#allocation6 + $0x3f] sm:$0x1] }
  0x32   :  { %v169_v0 = vmul.f32 %v168_v61, %v160_v45  ;;  %v170_v1 = vmul.f32 %v168_v61, %v161_v46  ;;  %v171_v2 = vmul.f32 %v168_v61, %v162_v50  ;;  %v172_v3 = vmul.f32 %v168_v61, %v163_v51 }
  0x33   :  { %v173_v6 = vmul.f32 %v168_v61, %v164_v52  ;;  %v174_v7 = vmul.f32 %v168_v61, %v165_v57  ;;  %v175_v8 = vmul.f32 %v168_v61, %v166_v58  ;;  %v176_v9 = vmul.f32 %v168_v61, %v167_v59 }
  0x34   :  { %v177_v13 = vadd.f32 %v169_v0, %v151_v47  ;;  %v178_v14 = vadd.f32 %v170_v1, %v152_v48  ;;  %v179_v15 = vadd.f32 %v171_v2, %v153_v49  ;;  %v180_v16 = vadd.f32 %v172_v3, %v154_v53 }
  0x35   :  { %v181_v20 = vadd.f32 %v173_v6, %v155_v54  ;;  %v182_v21 = vadd.f32 %v174_v7, %v156_v55  ;;  %v183_v22 = vadd.f32 %v175_v8, %v157_v56  ;;  %v184_v23 = vadd.f32 %v176_v9, %v158_v60 }
  0x36   :  { %v195_v24 = vmul.f32 %v194_v62, %v186_v4  ;;  %v196_v25 = vmul.f32 %v194_v62, %v187_v5  ;;  %v197_v26 = vmul.f32 %v194_v62, %v188_v10  ;;  %v198_v27 = vmul.f32 %v194_v62, %v189_v11 }
  0x37   :  { %v199_v30 = vmul.f32 %v194_v62, %v190_v12  ;;  %v200_v31 = vmul.f32 %v194_v62, %v191_v17  ;;  %v201_v32 = vmul.f32 %v194_v62, %v192_v18  ;;  %v202_v33 = vmul.f32 %v194_v62, %v193_v19 }
  0x38   :  { %v203_v37 = vadd.f32 %v195_v24, %v177_v13  ;;  %v204_v38 = vadd.f32 %v196_v25, %v178_v14  ;;  %v205_v39 = vadd.f32 %v197_v26, %v179_v15  ;;  %v206_v40 = vadd.f32 %v198_v27, %v180_v16 }
  0x39   :  { %v207_v44 = vadd.f32 %v199_v30, %v181_v20  ;;  %v208_v45 = vadd.f32 %v200_v31, %v182_v21  ;;  %v209_v46 = vadd.f32 %v201_v32, %v183_v22  ;;  %v210_v47 = vadd.f32 %v202_v33, %v184_v23 }
  0x3a   :  { %v221_v48 = vmul.f32 %v220_v63, %v212_v28  ;;  %v222_v49 = vmul.f32 %v220_v63, %v213_v29  ;;  %v223_v50 = vmul.f32 %v220_v63, %v214_v34  ;;  %v224_v51 = vmul.f32 %v220_v63, %v215_v35 }
  0x3b   :  { %v225_v52 = vmul.f32 %v220_v63, %v216_v36  ;;  %v226_v53 = vmul.f32 %v220_v63, %v217_v41  ;;  %v227_v54 = vmul.f32 %v220_v63, %v218_v42  ;;  %v228_v55 = vmul.f32 %v220_v63, %v219_v43 }
  0x3c   :  { %v229_v56 = vadd.f32 %v221_v48, %v203_v37  ;;  %v230_v57 = vadd.f32 %v222_v49, %v204_v38  ;;  %v231_v58 = vadd.f32 %v223_v50, %v205_v39  ;;  %v232_v59 = vadd.f32 %v224_v51, %v206_v40 }
  0x3d   :  { %v233_v60 = vadd.f32 %v225_v52, %v207_v44  ;;  %v234_v61 = vadd.f32 %v226_v53, %v208_v45  ;;  %v235_v62 = vadd.f32 %v227_v54, %v209_v46  ;;  %v236_v0 = vadd.f32 %v228_v55, %v210_v47 }
  0x3e   :  { %v245_v1 = vrot.slane %v230_v57, 7  ;;  %v248_v2 = vrot.slane %v231_v58, 6  ;;  %v251_v3 = vrot.slane %v232_v59, 5  ;;  %vm258_vm4 = vcmask 1045509  }
  0x3f   :  { %v254_v4 = vrot.slane %v233_v60, 4  ;;  %v257_v6 = vrot.slane %v234_v61, 3  ;;  %v260_v63 = vrot.slane %v235_v62, 2  ;;  %vm261_vm5 = vcmask 1046534  }
  0x40   :  { %v247_v5 = vsel %vm246_vm0, %v245_v1, %v229_v56  ;;  %v263_v9 = vrot.slane %v236_v0, 1  ;;  %vm264_vm6 = vcmask 1047559  }
  0x41   :  { %v250_v7 = vsel %vm249_vm1, %v248_v2, %v247_v5 }
  0x42   :  { %v253_v8 = vsel %vm252_vm2, %v251_v3, %v250_v7 }
  0x43   :  { %v256_v10 = vsel %vm255_vm3, %v254_v4, %v253_v8 }
  0x44   :  { %v259_v11 = vsel %vm258_vm4, %v257_v6, %v256_v10 }
  0x45   :  { %v262_v12 = vsel %vm261_vm5, %v260_v63, %v259_v11 }
  0x46   :  { %v265_v13 = vsel %vm264_vm6, %v263_v9, %v262_v12 }
  0x47   :  { %267 = vst [vmem:[#allocation7] sm:$0xff] %v265_v13 }
  0x48   :  { %272 = vsyncadd [#allocation4], 96  ;;  %s358_s26 = smov [#allocation7]  }
  0x49   :  { %s273_s27 = sshll.u32 %s358_s26, 4  ;;  %s274_s27 = int_to_ptr.vmem [resolvable:$true] %s273_s27 }
  0x4a   :  { %s328_s28 = scalar_lea.vmem %s274_s27, 32  ;;  %s332_s29 = scalar_lea.vmem %s274_s27, 128 }
  0x4b   :  { %p329_p5 = scmp.ne.s32.totalorder %s274_s27, %s328_s28  ;;  %p333_p6 = scmp.lt.s32.totalorder %s274_s27, %s274_s27 }
  0x4c   :  { %p334_p7 = scmp.lt.s32.totalorder %s332_s29, %s328_s28 }
  0x4e   :  { %p335_p8 = por %p334_p7, %p333_p6 }
  0x50   :  { %p336_p9 = pnand %p335_p8, %p329_p5 }
  0x52   :  { %339 = shalt.err (!%p336_p9)
}
  0x53   :  { %s359_s30 = smov 32   ;;  %s360_s3 = smov 2  }
  0x54   :  { %279 = dma.vmem_to_hbm [thread:$0]  %s274_s27, 32, %s406_s2, [#allocation4], %s359_s30, %s359_s30, %s360_s3  }
  0x55   :  { %352 = dma.done.wait [#allocation4], 128  }
  0x56   :  { %353 = vsyncadd [#allocation4], 4294967168 }
  0x57   :  { %283 = vsyncpa [#allocation3], 1 }
  0x58   :  { %284 = vsyncpa [#allocation4], 1 }
  0x59   :  { %285 = vsyncpa [#allocation5], 1 }

</bundles_post_ra>
